<compile_context>
chip_gen: v6e
topology: v6e:2x2x1
jax: 0.10.0
libtpu: 0.0.40
codegen_flags: <defaults>
</compile_context>

<pallas_src>
import jax
import jax.numpy as jnp
from jax.experimental import pallas as pl
from jax.experimental.pallas import tpu as pltpu

# ImageNet normalization constants (same as the torch module's __init__).
_MEAN = jnp.array([0.485, 0.456, 0.406], dtype=jnp.float32)
_STD = jnp.array([0.229, 0.224, 0.225], dtype=jnp.float32)

# Tile-size budget: <= 512K f32 elements (~2 MiB) per buffer.
_MAX_TILE_ELEMS = 512 * 1024
_MAX_LANE_TILE = 4096


def _normalize_kernel(img_ref, mean_ref, inv_std_ref, out_ref):
    # img_ref / out_ref : (R_TILE, HW_TILE) tile of the (N*C, H*W) slab.
    # mean_ref / inv_std_ref : (R_TILE, 1) f32 columns, broadcast over lanes.
    x = img_ref[...].astype(jnp.float32)
    out_ref[...] = ((x - mean_ref[...]) * inv_std_ref[...]).astype(out_ref.dtype)


def _pick_lane_tile(hw: int) -> int:
    """Largest multiple of 128 dividing hw (capped), else the full extent."""
    if hw % 128 != 0:
        return hw
    start = min(hw, _MAX_LANE_TILE)
    start = (start // 128) * 128
    for t in range(start, 0, -128):
        if hw % t == 0:
            return t
    return hw


def _pick_row_tile(rows: int, hw_tile: int) -> int:
    """Largest multiple of 8 dividing rows within the VMEM tile budget."""
    if rows % 8 != 0:
        return rows
    max_r = max(8, _MAX_TILE_ELEMS // max(hw_tile, 1))
    start = max(8, (min(rows, max_r) // 8) * 8)
    for r in range(start, 7, -8):
        if rows % r == 0:
            return r
    return rows


def normalization_forward(img: jax.Array) -> jax.Array:
    """(img - mean) / std with per-channel constants.  img is NCHW, C == 3."""
    n, c, h, w = img.shape
    assert c == _MEAN.shape[0], "Normalization expects 3 channels (RGB)."

    # Promote integer inputs (e.g. raw uint8 images) to f32, matching torch's
    # type promotion against the float mean/std tensors.
    if not jnp.issubdtype(img.dtype, jnp.floating):
        img = img.astype(jnp.float32)
    out_dtype = img.dtype

    rows, hw = n * c, h * w
    img2d = img.reshape(rows, hw)  # contiguous view, free reshape

    # Per-row (n, c) constants in f32: mean and precomputed 1/std.
    mean_col = jnp.tile(_MEAN, (n,)).reshape(rows, 1)
    inv_std_col = jnp.tile(1.0 / _STD, (n,)).reshape(rows, 1)

    hw_tile = _pick_lane_tile(hw)
    r_tile = _pick_row_tile(rows, hw_tile)
    grid = (rows // r_tile, hw // hw_tile)

    out2d = pl.pallas_call(
        _normalize_kernel,
        out_shape=jax.ShapeDtypeStruct((rows, hw), out_dtype),
        grid=grid,
        in_specs=[
            pl.BlockSpec((r_tile, hw_tile), lambda i, j: (i, j)),  # image tile
            pl.BlockSpec((r_tile, 1), lambda i, j: (i, 0)),        # mean col
            pl.BlockSpec((r_tile, 1), lambda i, j: (i, 0)),        # 1/std col
        ],
        out_specs=pl.BlockSpec((r_tile, hw_tile), lambda i, j: (i, j)),
        compiler_params=pltpu.CompilerParams(
            dimension_semantics=("parallel", "parallel")),
    )(img2d, mean_col, inv_std_col)

    return out2d.reshape(n, c, h, w)


if __name__ == "__main__":
    key = jax.random.PRNGKey(0)
    mean4 = _MEAN.reshape(1, 3, 1, 1)
    std4 = _STD.reshape(1, 3, 1, 1)

    # Small NCHW inputs consistent with the module (RGB image batches).
    #  - (2,3,16,16):  single-tile path (grid == (1,1))
    #  - (16,3,16,64): multi-row-tile path (grid > 1)
    #  - (2,3,15,17):  non-(8,128)-aligned fallback path (full-extent tiles)
    for shape in [(2, 3, 16, 16), (16, 3, 16, 64), (2, 3, 15, 17)]:
        key, sub = jax.random.split(key)
        x = jax.random.uniform(sub, shape, dtype=jnp.float32)

        out = jax.block_until_ready(normalization_forward(x))

        ref = (x - mean4) / std4
        assert out.shape == x.shape
        assert jnp.allclose(out, ref, atol=1e-5, rtol=1e-5), float(
            jnp.max(jnp.abs(out - ref)))

    print("KERNEL_OK")
</pallas_src>

<mosaic_0001>
module attributes {stable_mosaic.version = 11 : i64} {
  func.func @_normalize_kernel(%arg0: i32, %arg1: i32, %arg2: memref<6x256xf32, #tpu.memory_space<vmem>>, %arg3: memref<6x1xf32, #tpu.memory_space<vmem>>, %arg4: memref<6x1xf32, #tpu.memory_space<vmem>>, %arg5: memref<6x256xf32, #tpu.memory_space<vmem>>) attributes {dimension_semantics = [#tpu.dimension_semantics<parallel>, #tpu.dimension_semantics<parallel>], iteration_bounds = array<i64: 1, 1>, scalar_prefetch = 0 : i64, scratch_operands = 0 : i64, tpu.core_type = #tpu.core_type<tc>, window_params = [{transform_indices = @transform_0, window_bounds = array<i64: 6, 256>}, {transform_indices = @transform_1, window_bounds = array<i64: 6, 1>}, {transform_indices = @transform_2, window_bounds = array<i64: 6, 1>}, {transform_indices = @transform_3, window_bounds = array<i64: 6, 256>}]} {
    %c0 = arith.constant 0 : index
    %c0_0 = arith.constant 0 : index
    %0 = vector.load %arg2[%c0, %c0_0] : memref<6x256xf32, #tpu.memory_space<vmem>>, vector<6x256xf32>
    %c0_1 = arith.constant 0 : index
    %c0_2 = arith.constant 0 : index
    %1 = vector.load %arg3[%c0_1, %c0_2] : memref<6x1xf32, #tpu.memory_space<vmem>>, vector<6x1xf32>
    %2 = vector.broadcast %1 : vector<6x1xf32> to vector<6x256xf32>
    %3 = arith.subf %0, %2 : vector<6x256xf32>
    %c0_3 = arith.constant 0 : index
    %c0_4 = arith.constant 0 : index
    %4 = vector.load %arg4[%c0_3, %c0_4] : memref<6x1xf32, #tpu.memory_space<vmem>>, vector<6x1xf32>
    %5 = vector.broadcast %4 : vector<6x1xf32> to vector<6x256xf32>
    %6 = arith.mulf %3, %5 : vector<6x256xf32>
    %c0_5 = arith.constant 0 : index
    %c0_6 = arith.constant 0 : index
    %7 = vector.load %arg5[%c0_5, %c0_6] : memref<6x256xf32, #tpu.memory_space<vmem>>, vector<6x256xf32>
    tpu.vector_store %arg5[%c0_5, %c0_6], %6 {strides = array<i32>} : memref<6x256xf32, #tpu.memory_space<vmem>>, vector<6x256xf32>,
    return
  }
  func.func @transform_0(%arg0: i32, %arg1: i32) -> (i32, i32) {
    %c0_i32 = arith.constant 0 : i32
    return %arg0, %arg1 : i32, i32
  }
  func.func @transform_1(%arg0: i32, %arg1: i32) -> (i32, i32) {
    %c0_i32 = arith.constant 0 : i32
    %c0_i32_0 = arith.constant 0 : i32
    return %arg0, %c0_i32 : i32, i32
  }
  func.func @transform_2(%arg0: i32, %arg1: i32) -> (i32, i32) {
    %c0_i32 = arith.constant 0 : i32
    %c0_i32_0 = arith.constant 0 : i32
    return %arg0, %c0_i32 : i32, i32
  }
  func.func @transform_3(%arg0: i32, %arg1: i32) -> (i32, i32) {
    %c0_i32 = arith.constant 0 : i32
    return %arg0, %arg1 : i32, i32
  }
}

</mosaic_0001>

<bundles_post_ra>
// kernel: tpu_custom_call.1
= control target key start
LH: loop header
LB: loop body
LE: loop exit
PB: predicated region body
PF: predicated region fallthrough
CT: control target
= control target key end

     0   :  { %v74_v1 = vmov 0   ;;  %s111_s0 = inlined_call_operand.vmem [shape: f32[6,256], index: 0, kind: input, shape index: {}]   ;;  %s112_s1 = inlined_call_operand.vmem [shape: f32[6,1], index: 1, kind: input, shape index: {}]   ;;  %s113_s2 = inlined_call_operand.vmem [shape: f32[6,1], index: 2, kind: input, shape index: {}]   ;;  %s114_s3 = inlined_call_operand.hbm [shape: f32[6,256], index: 3, kind: output, shape index: {}]  }
   0x1   :  { %v17_v0 = vld [vmem:[%s112_s1] sm:$0x3f]  ;;  %51 = vset.pattern.permute.xlu0 %v74_v1 }
   0x2   :  { %8 = vsyncpa [#allocation3], 0  ;;  %20 = vperm.xlu0 %51, %v17_v0   ;;  %v25_v2 = vld [vmem:[%s113_s2] sm:$0x3f]  ;;  %v16_v5 = vld [vmem:[%s111_s0 + $0x8] sm:$0x3f] }
   0x3   :  { %v15_v4 = vld [vmem:[%s111_s0] sm:$0x3f]  ;;  %s75_s20 = smov [#allocation2]  }
   0x4   :  { %s41_s1 = sshll.u32 %s75_s20, 4  ;;  %s42_s1 = int_to_ptr.vmem [resolvable:$true] %s41_s1 }
   0x5   :  { %s52_s2 = scalar_lea.vmem %s42_s1, 256  ;;  %p57_p1 = scmp.lt.s32.totalorder %s42_s1, %s42_s1 }
   0x6   :  { %28 = vperm.xlu0 %51, %v25_v2   ;;  %p53_p0 = scmp.ne.s32.totalorder %s42_s1, %s52_s2  ;;  %p58_p2 = scmp.lt.s32.totalorder %s52_s2, %s52_s2 }
   0x8   :  { %p59_p3 = por %p58_p2, %p57_p1 }
   0xa   :  { %p60_p4 = pnand %p59_p3, %p53_p0 }
  0x7d   :  { %v21_v3 = vpop.permute.xlu0 %20 }
  0x7e   :  { %v23_v6 = vsub.f32 %v15_v4, %v21_v3  ;;  %v24_v7 = vsub.f32 %v16_v5, %v21_v3 }
  0x81   :  { %v29_v8 = vpop.permute.xlu0 %28 }
  0x82   :  { %v31_v9 = vmul.f32 %v29_v8, %v23_v6  ;;  %v32_v10 = vmul.f32 %v29_v8, %v24_v7 }
  0x84   :  { %33 = vst [vmem:[#allocation2] sm:$0x3f] %v31_v9  ;;  %34 = vst [vmem:[#allocation2 + $0x8] sm:$0x3f] %v32_v10 }
  0x85   :  { %63 = shalt.err (!%p60_p4)
}
  0x86   :  { %44 = dma.vmem_to_hbm [thread:$0]  %s42_s1, 256, %s114_s3, [#allocation3]  }
  0x87   :  { %72 = dma.done.wait [#allocation3], 256  }
  0x88   :  { %73 = vsyncadd [#allocation3], 4294967040 }
  0x89   :  { %48 = vsyncpa [#allocation3], 1 }

</bundles_post_ra>
